<compile_context>
chip_gen: v7x
topology: tpu7x:2x2x1
jax: 0.10.0
libtpu: 0.0.40
codegen_flags: <defaults>
</compile_context>

<pallas_src>
import functools

import jax
import jax.numpy as jnp
from jax import lax
from jax.experimental import pallas as pl
from jax.experimental.pallas import tpu as pltpu


# ---------------------------------------------------------------------------
# Hardware-aware budgets / tiling helpers
# ---------------------------------------------------------------------------
def _vmem_budget_bytes():
    """~half of physical VMEM: 64 MiB on v5e/v6e (128 MiB), 32 MiB on v7x (64 MiB)."""
    try:
        cap = pltpu.get_tpu_info().vmem_capacity_bytes
    except Exception:
        cap = 64 * 1024 * 1024  # conservative fallback
    return max(32 * 1024 * 1024, min(cap // 2, 96 * 1024 * 1024))


_VMEM_LIMIT = _vmem_budget_bytes()
_MAX_ROW_TILE = 1024 if _VMEM_LIMIT >= 64 * 1024 * 1024 else 512


def _round_up(x, m):
    return (x + m - 1) // m * m


def _pick_row_tile(n, max_tile):
    """Power-of-two row tile <= max_tile; rows are padded up to a multiple of it."""
    t = max_tile
    while t > 8 and t > n:
        t //= 2
    return t


def _pick_seq_tile(l, max_tile=256):
    t = max_tile
    while t >= 8:
        if l % t == 0:
            return t
        t //= 2
    # TODO(synk): masked-tail handling for sequence lengths with no small divisor.
    return l


# ---------------------------------------------------------------------------
# Parameter pre-packing (done ONCE, outside the forward pass)
# ---------------------------------------------------------------------------
def prepare_params(params, num_head, compute_dtype=jnp.float32):
    """Fold the 1/sqrt(dim_head) scale into Wq/bq, stack QKV weights as (3, D, D),
    and store the matmul weights in the compute dtype (bf16 fast path)."""
    d = params["wq"].shape[0]
    dh = d // num_head
    scale = dh ** (-0.5)
    w_qkv = jnp.stack([params["wq"] * scale, params["wk"], params["wv"]]
                      ).astype(compute_dtype)                       # (3, D, D)
    b_qkv = jnp.stack([params["bq"] * scale, params["bk"], params["bv"]]
                      ).reshape(3, 1, d).astype(jnp.float32)        # (3, 1, D)
    return {
        "w_qkv": w_qkv,
        "b_qkv": b_qkv,
        "wo": params["wo"].astype(compute_dtype),                   # (D, D)
        "bo": params["bo"].reshape(1, d).astype(jnp.float32),
        "gamma": params["gamma"].reshape(1, d).astype(jnp.float32),
        "beta": params["beta"].reshape(1, d).astype(jnp.float32),
    }


# ---------------------------------------------------------------------------
# Kernel 1: fused Q/K/V projection -> (3, N, D)
# ---------------------------------------------------------------------------
def _qkv_resident_kernel(x_ref, w_ref, b_ref, o_ref, *, compute_dtype):
    x = x_ref[...].astype(compute_dtype)                     # (TN, D)
    for j in range(3):                                       # static unroll: Q, K, V
        y = lax.dot_general(x, w_ref[j], (((1,), (1,)), ((), ())),
                            preferred_element_type=jnp.float32)
        o_ref[j] = y + b_ref[j]                              # lane-dense (TN, D) store


def _qkv_tiled_kernel(x_ref, w_ref, b_ref, o_ref, *, compute_dtype):
    x = x_ref[...].astype(compute_dtype)
    y = lax.dot_general(x, w_ref[0], (((1,), (1,)), ((), ())),
                        preferred_element_type=jnp.float32)
    o_ref[0] = y + b_ref[0]


def pallas_qkv_proj(x2d, w_qkv, b_qkv, compute_dtype, *, force_tiled=False):
    """qkv[j] = x2d @ w_qkv[j].T + b_qkv[j]; returns (3, N, D) float32."""
    n, d = x2d.shape
    tn = _pick_row_tile(n, _MAX_ROW_TILE)
    n_pad = _round_up(n, tn)
    if n_pad != n:
        x2d = jnp.pad(x2d, ((0, n_pad - n), (0, 0)))

    # Whole stacked weight resident only if it comfortably fits (double-buffered).
    w_bytes = 2 * w_qkv.size * w_qkv.dtype.itemsize
    resident = (w_bytes <= _VMEM_LIMIT // 4) and not force_tiled

    cost = pl.CostEstimate(
        flops=2 * n_pad * d * 3 * d,
        transcendentals=0,
        bytes_accessed=(x2d.size * 4 + w_qkv.size * w_qkv.dtype.itemsize
                        + b_qkv.size * 4 + 3 * n_pad * d * 4),
    )

    if resident:
        # Constant index map -> the (3, D, D) weight is DMA'd once and revisited.
        # TODO(synk): single-buffer the constant-index weight/bias blocks with
        # pipeline_mode=pl.Buffered(1) once verified on the target toolchain.
        out = pl.pallas_call(
            functools.partial(_qkv_resident_kernel, compute_dtype=compute_dtype),
            out_shape=jax.ShapeDtypeStruct((3, n_pad, d), jnp.float32),
            grid=(n_pad // tn,),
            in_specs=[
                pl.BlockSpec((tn, d), lambda i: (i, 0)),
                pl.BlockSpec((3, d, d), lambda i: (0, 0, 0)),
                pl.BlockSpec((3, 1, d), lambda i: (0, 0, 0)),
            ],
            out_specs=pl.BlockSpec((3, tn, d), lambda i: (0, i, 0)),
            compiler_params=pltpu.CompilerParams(
                dimension_semantics=("parallel",),
                vmem_limit_bytes=_VMEM_LIMIT,
            ),
            cost_estimate=cost,
        )(x2d, w_qkv, b_qkv)
    else:
        # Large-D fallback: extra grid axis over the 3 projections so only one
        # (D, D) weight slice is resident per step.
        # TODO(synk): add K-dim tiling with a VMEM accumulator for D where even
        # one (D, D) slice exceeds the budget.
        out = pl.pallas_call(
            functools.partial(_qkv_tiled_kernel, compute_dtype=compute_dtype),
            out_shape=jax.ShapeDtypeStruct((3, n_pad, d), jnp.float32),
            grid=(n_pad // tn, 3),
            in_specs=[
                pl.BlockSpec((tn, d), lambda i, j: (i, 0)),
                pl.BlockSpec((1, d, d), lambda i, j: (j, 0, 0)),
                pl.BlockSpec((1, 1, d), lambda i, j: (j, 0, 0)),
            ],
            out_specs=pl.BlockSpec((1, tn, d), lambda i, j: (j, i, 0)),
            compiler_params=pltpu.CompilerParams(
                dimension_semantics=("parallel", "parallel"),
                vmem_limit_bytes=_VMEM_LIMIT,
            ),
            cost_estimate=cost,
        )(x2d, w_qkv, b_qkv)

    return out[:, :n] if n_pad != n else out


# ---------------------------------------------------------------------------
# Kernel 2: flash-style scaled dot-product attention (online softmax),
# all H heads of one batch per grid step; KV axis is the innermost (arbitrary).
# ---------------------------------------------------------------------------
def _flash_attn_kernel(q_ref, k_ref, v_ref, o_ref, m_ref, l_ref, acc_ref, *,
                       compute_dtype):
    ki = pl.program_id(2)

    @pl.when(ki == 0)
    def _():
        m_ref[...] = jnp.full(m_ref.shape, -jnp.inf, jnp.float32)
        l_ref[...] = jnp.zeros(l_ref.shape, jnp.float32)
        acc_ref[...] = jnp.zeros(acc_ref.shape, jnp.float32)

    q = q_ref[...].astype(compute_dtype)                      # (H, TQ, dh)
    k = k_ref[...].astype(compute_dtype)                      # (H, TK, dh)
    # Scale is pre-folded into Wq, so no per-score multiply here.
    s = jnp.einsum("hqd,hkd->hqk", q, k, preferred_element_type=jnp.float32)
    m_prev = m_ref[...]
    m_new = jnp.maximum(m_prev, jnp.max(s, axis=-1, keepdims=True))
    alpha = jnp.exp(m_prev - m_new)
    p = jnp.exp(s - m_new)
    l_ref[...] = alpha * l_ref[...] + jnp.sum(p, axis=-1, keepdims=True)
    acc_ref[...] = alpha * acc_ref[...] + jnp.einsum(
        "hqk,hkd->hqd", p.astype(compute_dtype), v_ref[...].astype(compute_dtype),
        preferred_element_type=jnp.float32)
    m_ref[...] = m_new

    @pl.when(ki == pl.num_programs(2) - 1)
    def _():
        # Exact division (not approx reciprocal) for strict parity with PyTorch.
        o_ref[...] = (acc_ref[...] / l_ref[...]).astype(o_ref.dtype)


def pallas_flash_attention(q, k, v, compute_dtype):
    b, h, l, dh = q.shape
    tq = _pick_seq_tile(l)
    tk = _pick_seq_tile(l)
    nq, nk = l // tq, l // tk

    # Leading batch dim squeezed out of the kernel refs.
    qo_spec = pl.BlockSpec((None, h, tq, dh), lambda bi, qi, ki: (bi, 0, qi, 0))
    kv_spec = pl.BlockSpec((None, h, tk, dh), lambda bi, qi, ki: (bi, 0, ki, 0))

    cost = pl.CostEstimate(
        flops=4 * b * h * l * l * dh,
        transcendentals=b * h * l * l,
        bytes_accessed=4 * b * h * l * dh * (2 + 2 * nq),
    )
    return pl.pallas_call(
        functools.partial(_flash_attn_kernel, compute_dtype=compute_dtype),
        out_shape=jax.ShapeDtypeStruct((b, h, l, dh), jnp.float32),
        grid=(b, nq, nk),
        in_specs=[qo_spec, kv_spec, kv_spec],
        out_specs=qo_spec,
        scratch_shapes=[
            pltpu.VMEM((h, tq, 1), jnp.float32),    # running max  m
            pltpu.VMEM((h, tq, 1), jnp.float32),    # running sum  l
            pltpu.VMEM((h, tq, dh), jnp.float32),   # output accumulator
        ],
        compiler_params=pltpu.CompilerParams(
            dimension_semantics=("parallel", "parallel", "arbitrary"),
            vmem_limit_bytes=_VMEM_LIMIT,
        ),
        cost_estimate=cost,
    )(q, k, v)


# ---------------------------------------------------------------------------
# Kernel 3: output projection + residual + LayerNorm (fused), row-tiled.
# ---------------------------------------------------------------------------
def _out_ln_kernel(ctx_ref, x_ref, w_ref, b_ref, g_ref, beta_ref, o_ref, *,
                   eps, compute_dtype):
    ctx = ctx_ref[...].astype(compute_dtype)                  # (TN, D)
    y = lax.dot_general(ctx, w_ref[...], (((1,), (1,)), ((), ())),
                        preferred_element_type=jnp.float32)
    y = y + b_ref[...]
    # dropout(p=0.0) is the identity.
    y = y + x_ref[...]                                        # residual (f32)
    d_inv = 1.0 / y.shape[-1]
    mean = jnp.sum(y, axis=-1, keepdims=True) * d_inv
    mean_sq = jnp.sum(y * y, axis=-1, keepdims=True) * d_inv
    var = jnp.maximum(mean_sq - mean * mean, 0.0)             # one-pass biased var
    y_hat = (y - mean) * lax.rsqrt(var + eps)
    o_ref[...] = y_hat * g_ref[...] + beta_ref[...]           # lane-dense store


def pallas_out_ln(ctx2d, x2d, wo, bo, gamma, beta, compute_dtype, eps=1e-5):
    n, d = x2d.shape
    tn = _pick_row_tile(n, _MAX_ROW_TILE)
    n_pad = _round_up(n, tn)
    if n_pad != n:
        pad = ((0, n_pad - n), (0, 0))
        ctx2d = jnp.pad(ctx2d, pad)
        x2d = jnp.pad(x2d, pad)

    row = pl.BlockSpec((tn, d), lambda i: (i, 0))
    const = lambda r, c: pl.BlockSpec((r, c), lambda i: (0, 0))
    cost = pl.CostEstimate(
        flops=2 * n_pad * d * d + 10 * n_pad * d,
        transcendentals=n_pad,
        bytes_accessed=4 * (3 * n_pad * d + 3 * d) + wo.size * wo.dtype.itemsize,
    )
    out = pl.pallas_call(
        functools.partial(_out_ln_kernel, eps=eps, compute_dtype=compute_dtype),
        out_shape=jax.ShapeDtypeStruct((n_pad, d), jnp.float32),
        grid=(n_pad // tn,),
        in_specs=[row, row, const(d, d), const(1, d), const(1, d), const(1, d)],
        out_specs=row,
        compiler_params=pltpu.CompilerParams(
            dimension_semantics=("parallel",),
            vmem_limit_bytes=_VMEM_LIMIT,
        ),
        cost_estimate=cost,
    )(ctx2d, x2d, wo, bo, gamma, beta)
    return out[:n] if n_pad != n else out


# ---------------------------------------------------------------------------
# Full Multi_Head_Attention forward (takes pre-packed params)
# ---------------------------------------------------------------------------
def multi_head_attention(x, prepared, num_head, compute_dtype=jnp.float32):
    b, l, d = x.shape
    dh = d // num_head
    n = b * l
    x2d = x.reshape(n, d)

    qkv = pallas_qkv_proj(x2d, prepared["w_qkv"], prepared["b_qkv"],
                          compute_dtype)                       # (3, N, D)

    # Exact PyTorch .view semantics: contiguous leading-axis splits + row-major
    # flat reshapes (metadata only, no copy).
    q = qkv[0].reshape(b, num_head, l, dh)
    k = qkv[1].reshape(b, num_head, l, dh)
    v = qkv[2].reshape(b, num_head, l, dh)

    ctx = pallas_flash_attention(q, k, v, compute_dtype)       # (B, H, L, dh)
    ctx2d = ctx.reshape(n, d)                                  # flat reshape == .view

    out = pallas_out_ln(ctx2d, x2d, prepared["wo"], prepared["bo"],
                        prepared["gamma"], prepared["beta"], compute_dtype)
    return out.reshape(b, l, d)


# ---------------------------------------------------------------------------
# Pure-JAX reference (mirrors the PyTorch module exactly)
# ---------------------------------------------------------------------------
def reference(x, params, num_head):
    b, l, d = x.shape
    dh = d // num_head
    lin = lambda t, w, bb: t @ w.T + bb
    q = lin(x, params["wq"], params["bq"]).reshape(b * num_head, -1, dh)
    k = lin(x, params["wk"], params["bk"]).reshape(b * num_head, -1, dh)
    v = lin(x, params["wv"], params["bv"]).reshape(b * num_head, -1, dh)
    s = jnp.einsum("bqd,bkd->bqk", q, k) * dh ** (-0.5)
    p = jax.nn.softmax(s, axis=-1)
    ctx = jnp.einsum("bqk,bkd->bqd", p, v).reshape(b, -1, d)
    out = lin(ctx, params["wo"], params["bo"]) + x
    mean = out.mean(-1, keepdims=True)
    var = ((out - mean) ** 2).mean(-1, keepdims=True)
    return (out - mean) * lax.rsqrt(var + 1e-5) * params["gamma"] + params["beta"]


if __name__ == "__main__":
    B, L, D, H = 2, 8, 32, 4

    key = jax.random.PRNGKey(0)
    keys = jax.random.split(key, 10)
    init = lambda k, shape: (jax.random.normal(k, shape, jnp.float32) * 0.05)
    params = {
        "wq": init(keys[0], (D, D)), "bq": init(keys[1], (D,)),
        "wk": init(keys[2], (D, D)), "bk": init(keys[3], (D,)),
        "wv": init(keys[4], (D, D)), "bv": init(keys[5], (D,)),
        "wo": init(keys[6], (D, D)), "bo": init(keys[7], (D,)),
        "gamma": jnp.ones((D,), jnp.float32),
        "beta": jnp.zeros((D,), jnp.float32),
    }
    x = jax.random.normal(keys[8], (B, L, D), jnp.float32)

    ref = reference(x, params, H)

    # f32 path: strict parity with the PyTorch module.
    prep_f32 = prepare_params(params, H, jnp.float32)
    out = jax.block_until_ready(multi_head_attention(x, prep_f32, H, jnp.float32))
    assert out.shape == (B, L, D)
    assert jnp.allclose(out, ref, atol=2e-3, rtol=2e-3), "f32 path mismatch vs reference"

    # bf16 MXU operands with f32 accumulation: v6e/v7x fast path (weights stored bf16).
    prep_bf16 = prepare_params(params, H, jnp.bfloat16)
    out_bf16 = jax.block_until_ready(multi_head_attention(x, prep_bf16, H, jnp.bfloat16))
    assert out_bf16.shape == (B, L, D)
    assert jnp.allclose(out_bf16, ref, atol=5e-2, rtol=5e-2), "bf16 path mismatch vs reference"

    # Also exercise the large-D fallback (projection grid axis) for correctness.
    x2d = x.reshape(B * L, D)
    qkv_res = pallas_qkv_proj(x2d, prep_f32["w_qkv"], prep_f32["b_qkv"], jnp.float32)
    qkv_til = pallas_qkv_proj(x2d, prep_f32["w_qkv"], prep_f32["b_qkv"], jnp.float32,
                              force_tiled=True)
    assert jnp.allclose(qkv_res, qkv_til, atol=1e-5, rtol=1e-5), "tiled QKV mismatch"

    print("KERNEL_OK")
</pallas_src>

<mosaic_0001>
module attributes {stable_mosaic.version = 11 : i64} {
  func.func @_qkv_resident_kernel(%arg0: i32, %arg1: memref<16x32xf32, #tpu.memory_space<vmem>>, %arg2: memref<3x32x32xf32, #tpu.memory_space<vmem>>, %arg3: memref<3x1x32xf32, #tpu.memory_space<vmem>>, %arg4: memref<3x16x32xf32, #tpu.memory_space<vmem>>) attributes {dimension_semantics = [#tpu.dimension_semantics<parallel>], iteration_bounds = array<i64: 1>, scalar_prefetch = 0 : i64, scratch_operands = 0 : i64, tpu.core_type = #tpu.core_type<tc>, window_params = [{transform_indices = @transform_0, window_bounds = array<i64: 16, 32>}, {pipeline_mode = #tpu.pipeline_mode<synchronous>, transform_indices = @transform_1, window_bounds = array<i64: 3, 32, 32>}, {pipeline_mode = #tpu.pipeline_mode<synchronous>, transform_indices = @transform_2, window_bounds = array<i64: 3, 1, 32>}, {transform_indices = @transform_3, window_bounds = array<i64: 3, 16, 32>}]} {
    %c0 = arith.constant 0 : index
    %c0_0 = arith.constant 0 : index
    %0 = vector.load %arg1[%c0, %c0_0] : memref<16x32xf32, #tpu.memory_space<vmem>>, vector<16x32xf32>
    %c0_1 = arith.constant 0 : index
    %c0_2 = arith.constant 0 : index
    %c0_3 = arith.constant 0 : index
    %1 = vector.load %arg2[%c0_1, %c0_2, %c0_3] : memref<3x32x32xf32, #tpu.memory_space<vmem>>, vector<1x32x32xf32>
    %2 = vector.shape_cast %1 : vector<1x32x32xf32> to vector<32x32xf32>
    %cst = arith.constant dense<0.000000e+00> : vector<16x32xf32>
    %3 = tpu.matmul %0, %2, %cst {dimension_numbers = #tpu.dot_dimension_numbers<[1], [1], [0], [0], [0, 0, 1, 0], [], []>} : vector<16x32xf32>, vector<32x32xf32>, vector<16x32xf32> -> vector<16x32xf32>
    %c0_4 = arith.constant 0 : index
    %c0_5 = arith.constant 0 : index
    %c0_6 = arith.constant 0 : index
    %4 = vector.load %arg3[%c0_4, %c0_5, %c0_6] : memref<3x1x32xf32, #tpu.memory_space<vmem>>, vector<1x1x32xf32>
    %5 = vector.shape_cast %4 : vector<1x1x32xf32> to vector<1x32xf32>
    %6 = vector.broadcast %5 : vector<1x32xf32> to vector<16x32xf32>
    %7 = arith.addf %3, %6 : vector<16x32xf32>
    %c0_7 = arith.constant 0 : index
    %c0_8 = arith.constant 0 : index
    %c0_9 = arith.constant 0 : index
    %8 = vector.load %arg4[%c0_7, %c0_8, %c0_9] : memref<3x16x32xf32, #tpu.memory_space<vmem>>, vector<1x16x32xf32>
    %9 = vector.shape_cast %8 : vector<1x16x32xf32> to vector<16x32xf32>
    %10 = vector.shape_cast %7 : vector<16x32xf32> to vector<1x16x32xf32>
    tpu.vector_store %arg4[%c0_7, %c0_8, %c0_9], %10 {strides = array<i32>} : memref<3x16x32xf32, #tpu.memory_space<vmem>>, vector<1x16x32xf32>,
    %c1 = arith.constant 1 : index
    %c0_10 = arith.constant 0 : index
    %c0_11 = arith.constant 0 : index
    %11 = vector.load %arg2[%c1, %c0_10, %c0_11] : memref<3x32x32xf32, #tpu.memory_space<vmem>>, vector<1x32x32xf32>
    %12 = vector.shape_cast %11 : vector<1x32x32xf32> to vector<32x32xf32>
    %cst_12 = arith.constant dense<0.000000e+00> : vector<16x32xf32>
    %13 = tpu.matmul %0, %12, %cst_12 {dimension_numbers = #tpu.dot_dimension_numbers<[1], [1], [0], [0], [0, 0, 1, 0], [], []>} : vector<16x32xf32>, vector<32x32xf32>, vector<16x32xf32> -> vector<16x32xf32>
    %c1_13 = arith.constant 1 : index
    %c0_14 = arith.constant 0 : index
    %c0_15 = arith.constant 0 : index
    %14 = vector.load %arg3[%c1_13, %c0_14, %c0_15] : memref<3x1x32xf32, #tpu.memory_space<vmem>>, vector<1x1x32xf32>
    %15 = vector.shape_cast %14 : vector<1x1x32xf32> to vector<1x32xf32>
    %16 = vector.broadcast %15 : vector<1x32xf32> to vector<16x32xf32>
    %17 = arith.addf %13, %16 : vector<16x32xf32>
    %c1_16 = arith.constant 1 : index
    %c0_17 = arith.constant 0 : index
    %c0_18 = arith.constant 0 : index
    %18 = vector.load %arg4[%c1_16, %c0_17, %c0_18] : memref<3x16x32xf32, #tpu.memory_space<vmem>>, vector<1x16x32xf32>
    %19 = vector.shape_cast %18 : vector<1x16x32xf32> to vector<16x32xf32>
    %20 = vector.shape_cast %17 : vector<16x32xf32> to vector<1x16x32xf32>
    tpu.vector_store %arg4[%c1_16, %c0_17, %c0_18], %20 {strides = array<i32>} : memref<3x16x32xf32, #tpu.memory_space<vmem>>, vector<1x16x32xf32>,
    %c2 = arith.constant 2 : index
    %c0_19 = arith.constant 0 : index
    %c0_20 = arith.constant 0 : index
    %21 = vector.load %arg2[%c2, %c0_19, %c0_20] : memref<3x32x32xf32, #tpu.memory_space<vmem>>, vector<1x32x32xf32>
    %22 = vector.shape_cast %21 : vector<1x32x32xf32> to vector<32x32xf32>
    %cst_21 = arith.constant dense<0.000000e+00> : vector<16x32xf32>
    %23 = tpu.matmul %0, %22, %cst_21 {dimension_numbers = #tpu.dot_dimension_numbers<[1], [1], [0], [0], [0, 0, 1, 0], [], []>} : vector<16x32xf32>, vector<32x32xf32>, vector<16x32xf32> -> vector<16x32xf32>
    %c2_22 = arith.constant 2 : index
    %c0_23 = arith.constant 0 : index
    %c0_24 = arith.constant 0 : index
    %24 = vector.load %arg3[%c2_22, %c0_23, %c0_24] : memref<3x1x32xf32, #tpu.memory_space<vmem>>, vector<1x1x32xf32>
    %25 = vector.shape_cast %24 : vector<1x1x32xf32> to vector<1x32xf32>
    %26 = vector.broadcast %25 : vector<1x32xf32> to vector<16x32xf32>
    %27 = arith.addf %23, %26 : vector<16x32xf32>
    %c2_25 = arith.constant 2 : index
    %c0_26 = arith.constant 0 : index
    %c0_27 = arith.constant 0 : index
    %28 = vector.load %arg4[%c2_25, %c0_26, %c0_27] : memref<3x16x32xf32, #tpu.memory_space<vmem>>, vector<1x16x32xf32>
    %29 = vector.shape_cast %28 : vector<1x16x32xf32> to vector<16x32xf32>
    %30 = vector.shape_cast %27 : vector<16x32xf32> to vector<1x16x32xf32>
    tpu.vector_store %arg4[%c2_25, %c0_26, %c0_27], %30 {strides = array<i32>} : memref<3x16x32xf32, #tpu.memory_space<vmem>>, vector<1x16x32xf32>,
    return
  }
  func.func @transform_0(%arg0: i32) -> (i32, i32) {
    %c0_i32 = arith.constant 0 : i32
    %c0_i32_0 = arith.constant 0 : i32
    return %arg0, %c0_i32 : i32, i32
  }
  func.func @transform_1(%arg0: i32) -> (i32, i32, i32) {
    %c0_i32 = arith.constant 0 : i32
    %c0_i32_0 = arith.constant 0 : i32
    %c0_i32_1 = arith.constant 0 : i32
    %c0_i32_2 = arith.constant 0 : i32
    return %c0_i32, %c0_i32_0, %c0_i32_1 : i32, i32, i32
  }
  func.func @transform_2(%arg0: i32) -> (i32, i32, i32) {
    %c0_i32 = arith.constant 0 : i32
    %c0_i32_0 = arith.constant 0 : i32
    %c0_i32_1 = arith.constant 0 : i32
    %c0_i32_2 = arith.constant 0 : i32
    return %c0_i32, %c0_i32_0, %c0_i32_1 : i32, i32, i32
  }
  func.func @transform_3(%arg0: i32) -> (i32, i32, i32) {
    %c0_i32 = arith.constant 0 : i32
    %c0_i32_0 = arith.constant 0 : i32
    %c0_i32_1 = arith.constant 0 : i32
    return %c0_i32, %arg0, %c0_i32_0 : i32, i32, i32
  }
}

</mosaic_0001>

<bundles_post_ra>
// kernel: tpu_custom_call.1
= control target key start
LH: loop header
LB: loop body
LE: loop exit
PB: predicated region body
PF: predicated region fallthrough
CT: control target
= control target key end

     0   :  { %8 = vsyncpa [#allocation3], 0  ;;  %s684_s0 = inlined_call_operand.hbm [shape: f32[16,32], index: 0, kind: input, shape index: {}]   ;;  %s685_s1 = inlined_call_operand.hbm [shape: f32[3,32,32], index: 1, kind: input, shape index: {}]   ;;  %s686_s2 = inlined_call_operand.vmem [shape: f32[3,1,32], index: 2, kind: input, shape index: {}]   ;;  %s687_s3 = inlined_call_operand.hbm [shape: f32[3,16,32], index: 3, kind: output, shape index: {}]  }
   0x1   :  { %9 = vsyncpa [#allocation6], 0 }
   0x2   :  { %10 = vsyncpa [#allocation4], 0  ;;  %s563_s12 = smov [#allocation2]   ;;  %s491_s16 = scalar_lea.hbm %s684_s0, 256 }
   0x3   :  { %s16_s13 = sshll.u32 %s563_s12, 4  ;;  %p492_p0 = scmp.ne.s32.totalorder %s684_s0, %s491_s16  ;;  %s17_s13 = int_to_ptr.vmem [resolvable:$true] %s16_s13 }
   0x4   :  { %p495_p1 = scmp.lt.u32.totalorder %s491_s16, %s684_s0 }
   0x6   :  { %p497_p2 = pnand %p495_p1, %p492_p0 }
   0x8   :  { %500 = shalt.err (!%p497_p2)
}
   0x9   :  { %s501_s21 = scalar_lea.vmem %s17_s13, 256  ;;  %p506_p4 = scmp.lt.s32.totalorder %s17_s13, %s17_s13 }
   0xa   :  { %p502_p3 = scmp.ne.s32.totalorder %s17_s13, %s501_s21  ;;  %p507_p5 = scmp.lt.s32.totalorder %s501_s21, %s501_s21 }
   0xc   :  { %p508_p6 = por %p507_p5, %p506_p4 }
   0xe   :  { %p509_p7 = pnand %p508_p6, %p502_p3 }
  0x10   :  { %512 = shalt.err (!%p509_p7)
}
  0x11   :  { %s564_s22 = smov 128   ;;  %s565_s23 = smov 8  }
  0x12   :  { %22 = dma.hbm_to_vmem [thread:$0]  %s684_s0, 256, %s17_s13, [#allocation3], %s564_s22, %s564_s22, %s565_s23  }
  0x13   :  { %s566_s26 = smov [#allocation5]   ;;  %s513_s30 = scalar_lea.hbm %s685_s1, 1536 }
  0x14   :  { %s28_s27 = sshll.u32 %s566_s26, 4  ;;  %p514_p8 = scmp.ne.s32.totalorder %s685_s1, %s513_s30  ;;  %s29_s27 = int_to_ptr.vmem [resolvable:$true] %s28_s27 }
  0x15   :  { %p517_p9 = scmp.lt.u32.totalorder %s513_s30, %s685_s1 }
  0x17   :  { %p519_p10 = pnand %p517_p9, %p514_p8 }
  0x19   :  { %522 = shalt.err (!%p519_p10)
}
  0x1a   :  { %s523_s8 = scalar_lea.vmem %s29_s27, 1536  ;;  %p528_p12 = scmp.lt.s32.totalorder %s29_s27, %s29_s27 }
  0x1b   :  { %p524_p11 = scmp.ne.s32.totalorder %s29_s27, %s523_s8  ;;  %p529_p13 = scmp.lt.s32.totalorder %s523_s8, %s523_s8 }
  0x1d   :  { %p530_p0 = por %p529_p13, %p528_p12 }
  0x1f   :  { %p531_p1 = pnand %p530_p0, %p524_p11 }
  0x21   :  { %534 = shalt.err (!%p531_p1)
}
  0x22   :  { %34 = dma.hbm_to_vmem [thread:$0]  %s685_s1, 1536, %s29_s27, [#allocation6], %s564_s22, %s564_s22, %s565_s23  }
  0x23   :  { %557 = dma.done.wait [#allocation3], 256  }
  0x24   :  { %558 = vsyncadd [#allocation3], 4294967040 }
  0x25   :  { %559 = dma.done.wait [#allocation6], 1536  }
  0x26   :  { %560 = vsyncadd [#allocation6], 4294965760  ;;  %vm56_vm0 = vcmask 261120   ;;  %v45_v1 = vld [vmem:[#allocation5] sm:$0xff]  ;;  %v46_v2 = vld [vmem:[#allocation5 + $0x8] sm:$0xff]  ;;  %s567_s15 = smov [#allocation7]  }
  0x27   :  { %vm620_vm1 = vmpackc.low %vm56_vm0, %vm56_vm0  ;;  %v47_v3 = vld [vmem:[#allocation5 + $0x10] sm:$0xff]  ;;  %v450_v4 = vpack.c.bf16 %v46_v2, %v45_v1  ;;  %v48_v5 = vld [vmem:[#allocation5 + $0x18] sm:$0xff]  ;;  %s363_s16 = sshll.u32 %s567_s15, 4  ;;  %s364_s16 = int_to_ptr.vmem [resolvable:$true] %s363_s16 }
  0x28   :  { %v43_v6 = vld [vmem:[#allocation2] sm:$0xff]  ;;  %v153_v7 = vld [vmem:[#allocation5 + $0x20] sm:$0xff]  ;;  %v456_v8 = vpack.c.bf16 %v48_v5, %v47_v3  ;;  %v154_v9 = vld [vmem:[#allocation5 + $0x28] sm:$0xff]  ;;  %s535_s17 = scalar_lea.vmem %s364_s16, 768  ;;  %p540_p3 = scmp.lt.s32.totalorder %s364_s16, %s364_s16 }
  0x29   :  { %425 = vmatprep.mubr.msk.f32.mxu0 %vm56_vm0, %v43_v6  ;;  %436 = vmatprep.mubr.msk.f32.mxu1 %vm56_vm0, %v43_v6  ;;  %v462_v10 = vpack.c.bf16 %v154_v9, %v153_v7  ;;  %v155_v11 = vld [vmem:[#allocation5 + $0x30] sm:$0xff]  ;;  %v156_v12 = vld [vmem:[#allocation5 + $0x38] sm:$0xff]  ;;  %v256_v14 = vld [vmem:[#allocation5 + $0x40] sm:$0xff]  ;;  %p536_p2 = scmp.ne.s32.totalorder %s364_s16, %s535_s17  ;;  %p541_p4 = scmp.lt.s32.totalorder %s535_s17, %s535_s17 }
  0x2a   :  { %452 = vmatprep.subr.msk.bf16.mxu0 %vm620_vm1, %v450_v4  ;;  %v468_v13 = vpack.c.bf16 %v156_v12, %v155_v11  ;;  %v257_v15 = vld [vmem:[#allocation5 + $0x48] sm:$0xff]  ;;  %v258_v17 = vld [vmem:[#allocation5 + $0x50] sm:$0xff]  ;;  %v259_v18 = vld [vmem:[#allocation5 + $0x58] sm:$0xff] }
  0x2b   :  { %455 = vmatpush3.bf16.xpose.msk.msra.mxu0 %vm620_vm1, %v450_v4  ;;  %464 = vmatprep.subr.msk.bf16.mxu1 %vm620_vm1, %v462_v10  ;;  %v474_v16 = vpack.c.bf16 %v257_v15, %v256_v14  ;;  %v44_v19 = vld [vmem:[#allocation2 + $0x8] sm:$0xff]  ;;  %v480_v20 = vpack.c.bf16 %v259_v18, %v258_v17  ;;  %v376_v21 = vld [vmem:[%s686_s2] ss:$0 sm:$0xff]  ;;  %v384_v23 = vld [vmem:[%s686_s2 + $0x1] ss:$0 sm:$0xff]  ;;  %p542_p5 = por %p541_p4, %p540_p3 }
  0x2c   :  { %458 = vmatprep.subr.msk.bf16.mxu0 %vm620_vm1, %v456_v8  ;;  %467 = vmatpush3.bf16.xpose.msk.msra.mxu1 %vm620_vm1, %v462_v10  ;;  %v392_v31 = vld [vmem:[%s686_s2 + $0x2] ss:$0 sm:$0xff] }
  0x2d   :  { %470 = vmatprep.subr.msk.bf16.mxu1 %vm620_vm1, %v468_v13  ;;  %p543_p6 = pnand %p542_p5, %p536_p2 }
  0x33   :  { %461 = vmatpush3.bf16.xpose.msk.msra.mxu0 %vm620_vm1, %v456_v8 }
  0x34   :  { %476 = vmatprep.subr.msk.bf16.mxu0 %vm620_vm1, %v474_v16  ;;  %473 = vmatpush3.bf16.xpose.msk.msra.mxu1 %vm620_vm1, %v468_v13 }
  0x3a   :  { %426 = vmatmul.mubr.msk.f32.vlgmr.msra.gmra.mrb[0].mxu0 %vm56_vm0, %v44_v19 }
  0x3b   :  { %479 = vmatpush3.bf16.xpose.msk.msra.mxu0 %vm620_vm1, %v474_v16  ;;  %447 = vmatprep.mubr.msk.f32.mxu0 %vm56_vm0, %v43_v6 }
  0x3c   :  { %482 = vmatprep.subr.msk.bf16.mxu0 %vm620_vm1, %v480_v20  ;;  %437 = vmatmul.mubr.msk.f32.vlgmr.msra.gmra.mrb[0].mxu1 %vm56_vm0, %v44_v19 }
  0x43   :  { %485 = vmatpush3.bf16.xpose.msk.msra.mxu0 %vm620_vm1, %v480_v20 }
  0x4a   :  { %448 = vmatmul.mubr.msk.f32.vlgmr.msra.gmra.mrb[2].mxu0 %vm56_vm0, %v44_v19 }
 0x10d   :  { %v427_v22 = vpop.f32.mrb[0].mxu0 }
 0x10e   :  { %v147_v24 = vadd.f32 %v427_v22, %v376_v21  ;;  %v141_v25 = vpop.f32.mrb[1].mxu0 }
 0x10f   :  { %v142_v26 = vadd.f32 %v376_v21, %v141_v25  ;;  %v438_v27 = vpop.f32.mrb[0].mxu1 }
 0x110   :  { %151 = vst.msk [vmem:[#allocation7 + $0x8] sm:$0xff] %vm56_vm0, %v147_v24  ;;  %v249_v28 = vadd.f32 %v438_v27, %v384_v23  ;;  %v243_v29 = vpop.f32.mrb[1].mxu1 }
 0x111   :  { %150 = vst.msk [vmem:[#allocation7] sm:$0xff] %vm56_vm0, %v142_v26  ;;  %v244_v30 = vadd.f32 %v384_v23, %v243_v29 }
 0x112   :  { %254 = vst.msk [vmem:[#allocation7 + $0x18] sm:$0xff] %vm56_vm0, %v249_v28 }
 0x113   :  { %253 = vst.msk [vmem:[#allocation7 + $0x10] sm:$0xff] %vm56_vm0, %v244_v30 }
 0x11d   :  { %v449_v32 = vpop.f32.mrb[2].mxu0 }
 0x11e   :  { %v352_v33 = vadd.f32 %v449_v32, %v392_v31  ;;  %v346_v34 = vpop.f32.mrb[3].mxu0 }
 0x11f   :  { %v347_v35 = vadd.f32 %v392_v31, %v346_v34 }
 0x120   :  { %357 = vst.msk [vmem:[#allocation7 + $0x28] sm:$0xff] %vm56_vm0, %v352_v33 }
 0x121   :  { %356 = vst.msk [vmem:[#allocation7 + $0x20] sm:$0xff] %vm56_vm0, %v347_v35 }
 0x122   :  { %546 = shalt.err (!%p543_p6)
}
 0x123   :  { %s547_s19 = scalar_lea.hbm %s687_s3, 768 }
 0x124   :  { %p548_p7 = scmp.ne.s32.totalorder %s687_s3, %s547_s19  ;;  %p551_p8 = scmp.lt.u32.totalorder %s547_s19, %s687_s3 }
 0x126   :  { %p553_p9 = pnand %p551_p8, %p548_p7 }
 0x128   :  { %556 = shalt.err (!%p553_p9)
}
 0x129   :  { %369 = dma.vmem_to_hbm [thread:$0]  %s364_s16, 768, %s687_s3, [#allocation4], %s564_s22, %s564_s22, %s565_s23  }
 0x12a   :  { %561 = dma.done.wait [#allocation4], 768  }
 0x12b   :  { %562 = vsyncadd [#allocation4], 4294966528 }
 0x12c   :  { %373 = vsyncpa [#allocation3], 1 }
 0x12d   :  { %374 = vsyncpa [#allocation6], 1 }
 0x12e   :  { %375 = vsyncpa [#allocation4], 1 }

</bundles_post_ra>
